<compile_context>
chip_gen: v7x
topology: tpu7x:2x2x1
jax: 0.10.0
libtpu: 0.0.40
codegen_flags: <defaults>
</compile_context>

<pallas_src>
import numpy as np
import jax
import jax.numpy as jnp
from jax import lax
from jax.experimental import pallas as pl
from jax.experimental.pallas import tpu as pltpu


# ------------------------------ Pallas kernel -------------------------------

def _make_embed_kernel(batch, hw, eps):
    """Fused 1x1-conv (bias=False) + training-mode BatchNorm2d.

    In-kernel layout (lane-dense):
      x_ref:  (B, Cin, HW)   spatial positions on the 128-lane axis
      w_ref:  (Cout, Cin)
      gb_ref: (Cout, 2)      column 0 = gamma, column 1 = beta (f32)
      o_ref:  (B, Cout, HW)  HW is a multiple of 128 -> unmasked full-lane vst
    """
    inv_n = 1.0 / float(batch * hw)

    def kernel(x_ref, w_ref, gb_ref, o_ref):
        # Fold the batch into the lane dimension: (Cin, B*HW).  HW % 128 == 0
        # so this is pure tile placement (no relayout), and the single matmul
        # below loads the weights into the MXU exactly once.
        x_bc = jnp.concatenate([x_ref[b] for b in range(batch)], axis=-1)

        # 1x1 conv == matmul W(Cout,Cin) @ X(Cin, B*HW); f32 accumulation.
        y = jnp.dot(w_ref[...], x_bc,
                    preferred_element_type=jnp.float32)      # (Cout, B*HW) f32

        # Training-mode BatchNorm2d folded into one affine (all f32):
        #   var = E[y^2] - mean^2 (biased)
        #   a   = gamma * rsqrt(var + eps);  b = beta - mean * a
        #   out = y * a + b
        s = jnp.sum(y, axis=-1, keepdims=True)                # (Cout, 1)
        ss = jnp.sum(y * y, axis=-1, keepdims=True)           # (Cout, 1)
        mean = s * inv_n
        var = ss * inv_n - mean * mean
        gamma = gb_ref[:, 0:1]                                # (Cout, 1)
        beta = gb_ref[:, 1:2]                                 # (Cout, 1)
        a = lax.rsqrt(var + eps) * gamma
        shift = beta - mean * a
        out = (y * a + shift).astype(o_ref.dtype)             # (Cout, B*HW)

        # Lane-dense stores: static 128-aligned lane slices, full-width vst.
        for b in range(batch):
            o_ref[b] = out[:, b * hw:(b + 1) * hw]

    return kernel


# --------------------------------- wrapper -----------------------------------

def embed_forward(x, w, gamma, beta, *, eps=1e-5, mxu_dtype=jnp.bfloat16):
    """Embed.forward: BatchNorm2d(Conv2d_1x1(x; w)), training-mode BN.

    x: (B, Cin, H, W) NCHW.  w: (Cout, Cin) (the 1x1 conv kernel squeezed).
    gamma/beta: (Cout,) BN affine parameters.  Returns (B, Cout, H, W) in
    x.dtype.  MXU operands are cast to `mxu_dtype` in the wrapper (bf16 by
    default = full-rate MXU on all generations); accumulation and all BN math
    stay in f32.
    """
    B, Cin, H, W = x.shape
    Cout = w.shape[0]
    HW = H * W

    assert HW % 128 == 0, (
        "HW must be a multiple of 128 for the lane-dense single-block kernel")
    # TODO(synk): pad/mask variant for HW % 128 != 0 feature maps.

    # Free reshape only (no transpose): channels on sublanes, spatial on lanes.
    # Cast to the MXU input dtype here (halves x DMA bytes when bf16).
    x3 = x.reshape(B, Cin, HW).astype(mxu_dtype)
    w2 = w.astype(mxu_dtype)
    # Pack gamma/beta into a single operand -> one DMA instead of two.
    gb = jnp.stack([gamma, beta], axis=1).astype(jnp.float32)     # (Cout, 2)

    # Everything lives in VMEM for one un-pipelined invocation (no grid =>
    # no double buffering).  Leave headroom vs. v7x's 32 MiB scoped default.
    in_sz = jnp.dtype(mxu_dtype).itemsize
    out_sz = jnp.dtype(x.dtype).itemsize
    vmem_bytes = (in_sz * (B * Cin * HW + Cout * Cin)   # x, w
                  + 4 * (Cout * 2)                      # gamma/beta
                  + 4 * (Cout * B * HW)                 # f32 intermediate y
                  + out_sz * (B * Cout * HW))           # output
    assert vmem_bytes < 16 * 1024 * 1024, (
        "feature map too large for the single-block fused kernel; "
        "use the HW/Cout-tiled two-pass variant")
    # TODO(synk): tiled two-pass variant for production sizes (see header).

    kernel = _make_embed_kernel(B, HW, eps)
    y3 = pl.pallas_call(
        kernel,
        out_shape=jax.ShapeDtypeStruct((B, Cout, HW), x.dtype),
        in_specs=[
            pl.BlockSpec(memory_space=pltpu.MemorySpace.VMEM),
            pl.BlockSpec(memory_space=pltpu.MemorySpace.VMEM),
            pl.BlockSpec(memory_space=pltpu.MemorySpace.VMEM),
        ],
        out_specs=pl.BlockSpec(memory_space=pltpu.MemorySpace.VMEM),
    )(x3, w2, gb)

    return y3.reshape(B, Cout, H, W)


# ---------------------------- pure-JAX reference -----------------------------

def embed_reference(x, w, gamma, beta, eps=1e-5):
    y = jnp.einsum("oc,bchw->bohw", w, x)
    mean = jnp.mean(y, axis=(0, 2, 3), keepdims=True)
    var = jnp.var(y, axis=(0, 2, 3), keepdims=True)
    y = (y - mean) / jnp.sqrt(var + eps)
    return y * gamma[None, :, None, None] + beta[None, :, None, None]


# ------------------------------------ main ------------------------------------

if __name__ == "__main__":
    B, Cin, Cout, H, W = 2, 32, 16, 16, 16   # HW = 256 -> lane-dense output

    key = jax.random.PRNGKey(0)
    kx, kw = jax.random.split(key)
    x = jax.random.normal(kx, (B, Cin, H, W), jnp.float32)
    w = jax.random.normal(kw, (Cout, Cin), jnp.float32) / np.sqrt(Cin)
    gamma = jnp.ones((Cout,), jnp.float32)   # nn.BatchNorm2d default weight
    beta = jnp.zeros((Cout,), jnp.float32)   # nn.BatchNorm2d default bias

    y_ref = embed_reference(x, w, gamma, beta)

    # f32 MXU path: tight tolerance.
    y_f32 = jax.block_until_ready(
        embed_forward(x, w, gamma, beta, mxu_dtype=jnp.float32))
    assert y_f32.shape == (B, Cout, H, W)
    assert bool(jnp.all(jnp.isfinite(y_f32)))
    assert bool(jnp.allclose(y_f32, y_ref, rtol=1e-4, atol=1e-4)), (
        "f32 max abs err = %g" % float(jnp.max(jnp.abs(y_f32 - y_ref))))

    # Default bf16 MXU path (full-rate MXU): looser tolerance, f32 accumulate.
    y_bf16 = jax.block_until_ready(embed_forward(x, w, gamma, beta))
    assert y_bf16.shape == (B, Cout, H, W)
    assert bool(jnp.all(jnp.isfinite(y_bf16)))
    assert bool(jnp.allclose(y_bf16, y_ref, rtol=5e-2, atol=5e-2)), (
        "bf16 max abs err = %g" % float(jnp.max(jnp.abs(y_bf16 - y_ref))))

    print("KERNEL_OK")
</pallas_src>

<mosaic_0001>
module attributes {stable_mosaic.version = 11 : i64} {
  func.func @kernel(%arg0: memref<2x32x256xf32, #tpu.memory_space<vmem>>, %arg1: memref<16x32xf32, #tpu.memory_space<vmem>>, %arg2: memref<16x2xf32, #tpu.memory_space<vmem>>, %arg3: memref<2x16x256xf32, #tpu.memory_space<vmem>>) attributes {dimension_semantics = [], scalar_prefetch = 0 : i64, scratch_operands = 0 : i64, tpu.core_type = #tpu.core_type<tc>} {
    %c0 = arith.constant 0 : index
    %c0_0 = arith.constant 0 : index
    %c0_1 = arith.constant 0 : index
    %0 = vector.load %arg0[%c0, %c0_0, %c0_1] : memref<2x32x256xf32, #tpu.memory_space<vmem>>, vector<1x32x256xf32>
    %1 = vector.shape_cast %0 : vector<1x32x256xf32> to vector<32x256xf32>
    %c1 = arith.constant 1 : index
    %c0_2 = arith.constant 0 : index
    %c0_3 = arith.constant 0 : index
    %2 = vector.load %arg0[%c1, %c0_2, %c0_3] : memref<2x32x256xf32, #tpu.memory_space<vmem>>, vector<1x32x256xf32>
    %3 = vector.shape_cast %2 : vector<1x32x256xf32> to vector<32x256xf32>
    %4 = tpu.concatenate %1, %3 in 1 : vector<32x256xf32>, vector<32x256xf32> -> vector<32x512xf32>
    %c0_4 = arith.constant 0 : index
    %c0_5 = arith.constant 0 : index
    %5 = vector.load %arg1[%c0_4, %c0_5] : memref<16x32xf32, #tpu.memory_space<vmem>>, vector<16x32xf32>
    %cst = arith.constant dense<0.000000e+00> : vector<16x512xf32>
    %6 = tpu.matmul %5, %4, %cst {dimension_numbers = #tpu.dot_dimension_numbers<[1], [0], [0], [1], [0, 0, 1, 1], [], []>} : vector<16x32xf32>, vector<32x512xf32>, vector<16x512xf32> -> vector<16x512xf32>
    %cst_6 = arith.constant dense<0.000000e+00> : vector<16xf32>
    %7 = vector.multi_reduction <add>, %6, %cst_6 [1] : vector<16x512xf32> to vector<16xf32>
    %8 = vector.shape_cast %7 : vector<16xf32> to vector<16x1xf32>
    %9 = arith.mulf %6, %6 : vector<16x512xf32>
    %cst_7 = arith.constant dense<0.000000e+00> : vector<16xf32>
    %10 = vector.multi_reduction <add>, %9, %cst_7 [1] : vector<16x512xf32> to vector<16xf32>
    %11 = vector.shape_cast %10 : vector<16xf32> to vector<16x1xf32>
    %cst_8 = arith.constant 0.001953125 : f32
    %12 = vector.broadcast %cst_8 : f32 to vector<16x1xf32>
    %13 = arith.mulf %8, %12 : vector<16x1xf32>
    %cst_9 = arith.constant 0.001953125 : f32
    %14 = vector.broadcast %cst_9 : f32 to vector<16x1xf32>
    %15 = arith.mulf %11, %14 : vector<16x1xf32>
    %16 = arith.mulf %13, %13 : vector<16x1xf32>
    %17 = arith.subf %15, %16 : vector<16x1xf32>
    %c0_10 = arith.constant 0 : index
    %c0_11 = arith.constant 0 : index
    %18 = vector.load %arg2[%c0_10, %c0_11] : memref<16x2xf32, #tpu.memory_space<vmem>>, vector<16x1xf32>
    %c0_12 = arith.constant 0 : index
    %c1_13 = arith.constant 1 : index
    %19 = vector.load %arg2[%c0_12, %c1_13] : memref<16x2xf32, #tpu.memory_space<vmem>>, vector<16x1xf32>
    %cst_14 = arith.constant 9.99999974E-6 : f32
    %20 = vector.broadcast %cst_14 : f32 to vector<16x1xf32>
    %21 = arith.addf %17, %20 : vector<16x1xf32>
    %22 = math.rsqrt %21 : vector<16x1xf32>
    %23 = arith.mulf %22, %18 : vector<16x1xf32>
    %24 = arith.mulf %13, %23 : vector<16x1xf32>
    %25 = arith.subf %19, %24 : vector<16x1xf32>
    %26 = vector.broadcast %23 : vector<16x1xf32> to vector<16x512xf32>
    %27 = arith.mulf %6, %26 : vector<16x512xf32>
    %28 = vector.broadcast %25 : vector<16x1xf32> to vector<16x512xf32>
    %29 = arith.addf %27, %28 : vector<16x512xf32>
    %30 = vector.extract_strided_slice %29 {offsets = [0, 0], sizes = [16, 256], strides = [1, 1]} : vector<16x512xf32> to vector<16x256xf32>
    %c0_15 = arith.constant 0 : index
    %c0_16 = arith.constant 0 : index
    %c0_17 = arith.constant 0 : index
    %31 = vector.load %arg3[%c0_15, %c0_16, %c0_17] : memref<2x16x256xf32, #tpu.memory_space<vmem>>, vector<1x16x256xf32>
    %32 = vector.shape_cast %31 : vector<1x16x256xf32> to vector<16x256xf32>
    %33 = vector.shape_cast %30 : vector<16x256xf32> to vector<1x16x256xf32>
    tpu.vector_store %arg3[%c0_15, %c0_16, %c0_17], %33 {strides = array<i32>} : memref<2x16x256xf32, #tpu.memory_space<vmem>>, vector<1x16x256xf32>,
    %34 = vector.extract_strided_slice %29 {offsets = [0, 256], sizes = [16, 256], strides = [1, 1]} : vector<16x512xf32> to vector<16x256xf32>
    %c1_18 = arith.constant 1 : index
    %c0_19 = arith.constant 0 : index
    %c0_20 = arith.constant 0 : index
    %35 = vector.load %arg3[%c1_18, %c0_19, %c0_20] : memref<2x16x256xf32, #tpu.memory_space<vmem>>, vector<1x16x256xf32>
    %36 = vector.shape_cast %35 : vector<1x16x256xf32> to vector<16x256xf32>
    %37 = vector.shape_cast %34 : vector<16x256xf32> to vector<1x16x256xf32>
    tpu.vector_store %arg3[%c1_18, %c0_19, %c0_20], %37 {strides = array<i32>} : memref<2x16x256xf32, #tpu.memory_space<vmem>>, vector<1x16x256xf32>,
    return
  }
}

</mosaic_0001>

<bundles_post_ra>
// kernel: tpu_custom_call.1
= control target key start
LH: loop header
LB: loop body
LE: loop exit
PB: predicated region body
PF: predicated region fallthrough
CT: control target
= control target key end

     0   :  { %8 = vsyncpa [#allocation3], 0  ;;  %s528_s0 = inlined_call_operand.hbm [shape: f32[2,32,256], index: 0, kind: input, shape index: {}]   ;;  %s529_s1 = inlined_call_operand.vmem [shape: f32[16,32], index: 1, kind: input, shape index: {}]   ;;  %s530_s2 = inlined_call_operand.vmem [shape: f32[16,2], index: 2, kind: input, shape index: {}]   ;;  %s531_s3 = inlined_call_operand.hbm [shape: f32[2,16,256], index: 3, kind: output, shape index: {}]  }
   0x1   :  { %9 = vsyncpa [#allocation4], 0  ;;  %s410_s12 = smov [#allocation2]   ;;  %s362_s16 = scalar_lea.hbm %s528_s0, 2048 }
   0x2   :  { %s15_s13 = sshll.u32 %s410_s12, 4  ;;  %p363_p0 = scmp.ne.s32.totalorder %s528_s0, %s362_s16  ;;  %s16_s13 = int_to_ptr.vmem [resolvable:$true] %s15_s13 }
   0x3   :  { %p366_p1 = scmp.lt.u32.totalorder %s362_s16, %s528_s0 }
   0x5   :  { %p368_p2 = pnand %p366_p1, %p363_p0 }
   0x7   :  { %371 = shalt.err (!%p368_p2)
}
   0x8   :  { %s372_s21 = scalar_lea.vmem %s16_s13, 2048  ;;  %p377_p4 = scmp.lt.s32.totalorder %s16_s13, %s16_s13 }
   0x9   :  { %p373_p3 = scmp.ne.s32.totalorder %s16_s13, %s372_s21  ;;  %p378_p5 = scmp.lt.s32.totalorder %s372_s21, %s372_s21 }
   0xb   :  { %p379_p6 = por %p378_p5, %p377_p4 }
   0xd   :  { %p380_p7 = pnand %p379_p6, %p373_p3 }
   0xf   :  { %383 = shalt.err (!%p380_p7)
}
  0x10   :  { %s411_s22 = smov 256   ;;  %s412_s23 = smov 16  }
  0x11   :  { %21 = dma.hbm_to_vmem [thread:$0]  %s528_s0, 2048, %s16_s13, [#allocation3], %s411_s22, %s411_s22, %s412_s23  }
  0x12   :  { %406 = dma.done.wait [#allocation3], 2048  }
  0x13   :  { %407 = vsyncadd [#allocation3], 4294965248  ;;  %v413_v0 = vmov 0.0   ;;  %v30_v1 = vld [vmem:[#allocation2 + $0x8] sm:$0xff]  ;;  %v32_v2 = vld [vmem:[#allocation2 + $0x18] sm:$0xff]  ;;  %vm48_vm0 = vcmask 261120  }
  0x14   :  { %119 = vmatprep.mubr.f32.mxu0 %v413_v0  ;;  %196 = vmatprep.mubr.f32.mxu1 %v413_v0  ;;  %v29_v3 = vld [vmem:[#allocation2] sm:$0xff]  ;;  %v331_v4 = vpack.c.bf16 %v32_v2, %v30_v1  ;;  %v31_v5 = vld [vmem:[#allocation2 + $0x10] sm:$0xff]  ;;  %v39_v6 = vld [vmem:[#allocation2 + $0x48] sm:$0xff]  ;;  %v414_v55 = vmov 0   ;;  %s416_s5 = smov 1  }
  0x15   :  { %v41_v7 = vld [vmem:[#allocation2 + $0x58] sm:$0xff]  ;;  %v333_v8 = vpack.c.bf16 %v31_v5, %v29_v3  ;;  %v38_v10 = vld [vmem:[#allocation2 + $0x40] sm:$0xff]  ;;  %v40_v11 = vld [vmem:[#allocation2 + $0x50] sm:$0xff]  ;;  %355 = vset.pattern.permute.xlu1 %v414_v55 }
  0x16   :  { %v339_v9 = vpack.c.bf16 %v41_v7, %v39_v6  ;;  %v34_v12 = vld [vmem:[#allocation2 + $0x28] sm:$0xff]  ;;  %332 = vmatprep.subr.bf16.mxu0 %v331_v4  ;;  %v341_v13 = vpack.c.bf16 %v40_v11, %v38_v10  ;;  %v36_v14 = vld [vmem:[#allocation2 + $0x38] sm:$0xff]  ;;  %v33_v15 = vld [vmem:[#allocation2 + $0x20] sm:$0xff]  ;;  %v415_v6 = vmov 1  }
  0x17   :  { %v35_v16 = vld [vmem:[#allocation2 + $0x30] sm:$0xff]  ;;  %334 = vmatpush1.bf16.msra.mxu0 %v333_v8  ;;  %v335_v17 = vpack.c.bf16 %v36_v14, %v34_v12  ;;  %v43_v19 = vld [vmem:[#allocation2 + $0x68] sm:$0xff]  ;;  %v45_v20 = vld [vmem:[#allocation2 + $0x78] sm:$0xff]  ;;  %356 = vset.pattern.permute.xlu0 %v415_v6 }
  0x18   :  { %340 = vmatprep.subr.bf16.mxu1 %v339_v9  ;;  %v337_v18 = vpack.c.bf16 %v35_v16, %v33_v15  ;;  %v42_v21 = vld [vmem:[#allocation2 + $0x60] sm:$0xff]  ;;  %v343_v22 = vpack.c.bf16 %v45_v20, %v43_v19  ;;  %v44_v23 = vld [vmem:[#allocation2 + $0x70] sm:$0xff]  ;;  %v47_v26 = vld [vmem:[%s529_s1 + $0x8] sm:$0xff] }
  0x19   :  { %342 = vmatpush1.bf16.msra.mxu1 %v341_v13  ;;  %336 = vmatprep.subr.bf16.mxu0 %v335_v17  ;;  %v345_v24 = vpack.c.bf16 %v44_v23, %v42_v21  ;;  %v46_v25 = vld [vmem:[%s529_s1] sm:$0xff]  ;;  %v246_v10 = vld [vmem:[%s530_s2 + $0x8] sm:$0xff] }
  0x1a   :  { %344 = vmatprep.subr.bf16.mxu1 %v343_v22  ;;  %v245_v7 = vld [vmem:[%s530_s2] sm:$0xff]  ;;  %s417_s2 = smov [#allocation5]  }
  0x1b   :  { %338 = vmatpush1.bf16.msra.mxu0 %v337_v18  ;;  %s315_s6 = sshll.u32 %s417_s2, 4  ;;  %s316_s6 = int_to_ptr.vmem [resolvable:$true] %s315_s6 }
  0x1c   :  { %s384_s7 = scalar_lea.vmem %s316_s6, 1024  ;;  %p389_p9 = scmp.lt.s32.totalorder %s316_s6, %s316_s6 }
  0x1d   :  { %346 = vmatpush1.bf16.msra.mxu1 %v345_v24  ;;  %p385_p8 = scmp.ne.s32.totalorder %s316_s6, %s384_s7  ;;  %p390_p10 = scmp.lt.s32.totalorder %s384_s7, %s384_s7 }
  0x1e   :  { %327 = vmatmul.mubr.msk.f32.vlgmr.msra.gmra.mrb[0].mxu0 %vm48_vm0, %v46_v25 }
  0x1f   :  { %125 = vmatprep.mubr.f32.mxu0 %v413_v0  ;;  %p391_p11 = por %p390_p10, %p389_p9 }
  0x20   :  { %329 = vmatmul.mubr.msk.f32.vlgmr.msra.gmra.mrb[0].mxu1 %vm48_vm0, %v46_v25 }
  0x21   :  { %202 = vmatprep.mubr.f32.mxu1 %v413_v0  ;;  %p392_p12 = pnand %p391_p11, %p385_p8 }
  0x22   :  { %328 = vmatmul.mubr.msk.f32.gmra.mrb[2].mxu0 %vm48_vm0, %v47_v26 }
  0x24   :  { %330 = vmatmul.mubr.msk.f32.gmra.mrb[2].mxu1 %vm48_vm0, %v47_v26 }
  0xf1   :  { %v459_v27 = vpop.f32.mrb[0].mxu0 }
  0xf2   :  { %v219_v28 = vmul.f32 %v459_v27, %v459_v27  ;;  %v463_v29 = vpop.f32.mrb[1].mxu0 }
  0xf3   :  { %v465_v30 = vpop.f32.mrb[0].mxu1  ;;  %v209_v31 = vadd.f32 %v463_v29, %v459_v27  ;;  %v220_v32 = vmul.f32 %v463_v29, %v463_v29 }
  0xf4   :  { %v471_v33 = vpop.f32.mrb[1].mxu1  ;;  %v221_v34 = vmul.f32 %v465_v30, %v465_v30 }
  0xf5   :  { %v475_v35 = vpop.f32.mrb[2].mxu0  ;;  %v210_v36 = vadd.f32 %v209_v31, %v465_v30  ;;  %v227_v37 = vadd.f32 %v220_v32, %v219_v28  ;;  %v222_v46 = vmul.f32 %v471_v33, %v471_v33 }
  0xf6   :  { %v223_v38 = vmul.f32 %v475_v35, %v475_v35  ;;  %v480_v39 = vpop.f32.mrb[3].mxu0 }
  0xf7   :  { %v482_v40 = vpop.f32.mrb[2].mxu1  ;;  %v214_v41 = vadd.f32 %v480_v39, %v475_v35  ;;  %v224_v42 = vmul.f32 %v480_v39, %v480_v39  ;;  %v211_v45 = vadd.f32 %v210_v36, %v471_v33  ;;  %v228_v47 = vadd.f32 %v227_v37, %v221_v34 }
  0xf8   :  { %v225_v43 = vmul.f32 %v482_v40, %v482_v40  ;;  %v490_v44 = vpop.f32.mrb[3].mxu1 }
  0xf9   :  { %v232_v48 = vadd.f32 %v224_v42, %v223_v38  ;;  %212 = vadd.xlane.f32.xlu0 %v211_v45  ;;  %v215_v49 = vadd.f32 %v214_v41, %v482_v40  ;;  %v229_v50 = vadd.f32 %v228_v47, %v222_v46  ;;  %v226_v51 = vmul.f32 %v490_v44, %v490_v44 }
  0xfb   :  { %v216_v52 = vadd.f32 %v215_v49, %v490_v44  ;;  %v233_v53 = vadd.f32 %v232_v48, %v225_v43  ;;  %230 = vadd.xlane.f32.xlu1 %v229_v50 }
  0xfd   :  { %217 = vadd.xlane.f32.xlu0 %v216_v52  ;;  %v234_v54 = vadd.f32 %v233_v53, %v226_v51 }
  0xff   :  { %235 = vadd.xlane.f32.xlu1 %v234_v54 }
 0x186   :  { %v213_v56 = vpop.xlane.xlu0 %212 }
 0x187   :  { %v237_v57 = vmul.f32 0.001953125, %v213_v56 }
 0x188   :  { %v231_v59 = vpop.xlane.xlu1 %230 }
 0x189   :  { %v241_v58 = vmul.f32 %v237_v57, %v237_v57  ;;  %v239_v60 = vmul.f32 0.001953125, %v231_v59 }
 0x18a   :  { %v218_v61 = vpop.xlane.xlu0 %217 }
 0x18b   :  { %v238_v62 = vmul.f32 0.001953125, %v218_v61  ;;  %v243_v63 = vsub.f32 %v239_v60, %v241_v58 }
 0x18c   :  { %v236_v1 = vpop.xlane.xlu1 %235 }
 0x18d   :  { %v242_v0 = vmul.f32 %v238_v62, %v238_v62  ;;  %v247_v2 = vadd.f32 1e-05, %v243_v63  ;;  %v240_v3 = vmul.f32 0.001953125, %v236_v1 }
 0x18f   :  { %358 = vrsqrt.f32 %v247_v2  ;;  %v244_v4 = vsub.f32 %v240_v3, %v242_v0 }
 0x191   :  { %v248_v5 = vadd.f32 1e-05, %v244_v4 }
 0x193   :  { %360 = vrsqrt.f32 %v248_v5 }
 0x199   :  { %v359_v8 = vpop.eup %358 }
 0x19a   :  { %v251_v9 = vmul.f32 %v359_v8, %v245_v7 }
 0x19c   :  { %v253_v11 = vmul.f32 %v251_v9, %v237_v57 }
 0x19d   :  { %v361_v12 = vpop.eup %360 }
 0x19e   :  { %257 = vrot.lane.b32.xlu0 %v253_v11, %s416_s5  ;;  %v252_v13 = vmul.f32 %v361_v12, %v246_v10 }
 0x1a0   :  { %v254_v14 = vmul.f32 %v252_v13, %v238_v62 }
 0x1a2   :  { %259 = vrot.lane.b32.xlu1 %v254_v14, %s416_s5 }
 0x1a6   :  { %267 = vperm.xlu1 %355, %v251_v9  }
 0x1aa   :  { %272 = vperm.xlu1 %355, %v252_v13  }
 0x1ae   :  { %357 = vset.pattern.permute.xlu1 %v415_v6 }
 0x210   :  { %v258_v15 = vpop.permute.xlu0 %257 }
 0x211   :  { %v263_v16 = vsub.f32 %v245_v7, %v258_v15 }
 0x213   :  { %285 = vperm.xlu0 %356, %v263_v16  }
 0x214   :  { %v260_v17 = vpop.permute.xlu1 %259 }
 0x215   :  { %v264_v18 = vsub.f32 %v246_v10, %v260_v17 }
 0x217   :  { %290 = vperm.xlu1 %357, %v264_v18  }
 0x225   :  { %v268_v19 = vpop.permute.xlu1 %267 }
 0x226   :  { %v275_v20 = vmul.f32 %v268_v19, %v459_v27  ;;  %v276_v21 = vmul.f32 %v268_v19, %v463_v29  ;;  %v277_v22 = vmul.f32 %v268_v19, %v465_v30  ;;  %v278_v23 = vmul.f32 %v268_v19, %v471_v33 }
 0x229   :  { %v273_v24 = vpop.permute.xlu1 %272 }
 0x22a   :  { %v279_v27 = vmul.f32 %v273_v24, %v475_v35  ;;  %v280_v29 = vmul.f32 %v273_v24, %v480_v39  ;;  %v281_v30 = vmul.f32 %v273_v24, %v482_v40  ;;  %v282_v33 = vmul.f32 %v273_v24, %v490_v44 }
 0x292   :  { %v286_v25 = vpop.permute.xlu0 %285 }
 0x293   :  { %v293_v26 = vadd.f32 %v286_v25, %v275_v20  ;;  %v294_v28 = vadd.f32 %v286_v25, %v276_v21  ;;  %v295_v31 = vadd.f32 %v286_v25, %v277_v22  ;;  %v296_v32 = vadd.f32 %v286_v25, %v278_v23 }
 0x295   :  { %301 = vst [vmem:[#allocation5] sm:$0xff] %v293_v26  ;;  %302 = vst [vmem:[#allocation5 + $0x8] sm:$0xff] %v294_v28 }
 0x296   :  { %306 = vst [vmem:[#allocation5 + $0x20] sm:$0xff] %v295_v31  ;;  %307 = vst [vmem:[#allocation5 + $0x28] sm:$0xff] %v296_v32  ;;  %v291_v34 = vpop.permute.xlu1 %290 }
 0x297   :  { %v297_v36 = vadd.f32 %v291_v34, %v279_v27  ;;  %v298_v37 = vadd.f32 %v291_v34, %v280_v29  ;;  %v299_v38 = vadd.f32 %v291_v34, %v281_v30  ;;  %v300_v41 = vadd.f32 %v291_v34, %v282_v33 }
 0x299   :  { %303 = vst [vmem:[#allocation5 + $0x10] sm:$0xff] %v297_v36  ;;  %304 = vst [vmem:[#allocation5 + $0x18] sm:$0xff] %v298_v37 }
 0x29a   :  { %308 = vst [vmem:[#allocation5 + $0x30] sm:$0xff] %v299_v38  ;;  %309 = vst [vmem:[#allocation5 + $0x38] sm:$0xff] %v300_v41 }
 0x29b   :  { %395 = shalt.err (!%p392_p12)
}
 0x29c   :  { %s396_s10 = scalar_lea.hbm %s531_s3, 1024 }
 0x29d   :  { %p397_p13 = scmp.ne.s32.totalorder %s531_s3, %s396_s10  ;;  %p400_p0 = scmp.lt.u32.totalorder %s396_s10, %s531_s3 }
 0x29f   :  { %p402_p1 = pnand %p400_p0, %p397_p13 }
 0x2a1   :  { %405 = shalt.err (!%p402_p1)
}
 0x2a2   :  { %321 = dma.vmem_to_hbm [thread:$0]  %s316_s6, 1024, %s531_s3, [#allocation4], %s411_s22, %s411_s22, %s412_s23  }
 0x2a3   :  { %408 = dma.done.wait [#allocation4], 1024  }
 0x2a4   :  { %409 = vsyncadd [#allocation4], 4294966272 }
 0x2a5   :  { %325 = vsyncpa [#allocation3], 1 }
 0x2a6   :  { %326 = vsyncpa [#allocation4], 1 }

</bundles_post_ra>
